<compile_context>
chip_gen: v7x
topology: tpu7x:2x2x1
jax: 0.10.0
libtpu: 0.0.40
codegen_flags: <defaults>
</compile_context>

<pallas_src>
import jax
import jax.numpy as jnp
from jax import lax
from jax.experimental import pallas as pl
from jax.experimental.pallas import tpu as pltpu


# ----------------------------- kernel -------------------------------------- #

def fused_gcn_kernel(blk_ref, adj_ref, x_ref, w_ref, b_ref, o_ref):
    """One grid step of  out[i,j] += adj[i,k] @ (x[k] @ W[j].T + b[j]).

    blk_ref : SMEM int32 [n_i_blocks, n_k_blocks] non-empty adj-block flags
    adj_ref : bf16 [tm, tk]      x_ref : bf16 [tk, Fin]
    w_ref   : bf16 [tn, Fin]     b_ref : f32  [1, tn]
    o_ref   : f32  [tm, tn]  (resident across the k grid axis)
    """
    i = pl.program_id(0)
    k = pl.program_id(2)

    @pl.when(k == 0)
    def _():
        o_ref[...] = jnp.zeros_like(o_ref)

    @pl.when(blk_ref[i, k] != 0)
    def _():
        # h_tile = x_tile @ W_tile.T + b   (contract over Fin, f32 accumulate)
        h = lax.dot_general(
            x_ref[...], w_ref[...],
            dimension_numbers=(((1,), (1,)), ((), ())),
            preferred_element_type=jnp.float32,
        ) + b_ref[...]
        # out_tile += adj_tile @ h_tile   (bf16 MXU inputs, f32 accumulate)
        o_ref[...] += jnp.dot(
            adj_ref[...], h.astype(jnp.bfloat16),
            preferred_element_type=jnp.float32,
        )


# ----------------------------- wrapper -------------------------------------- #

def gcn_layer_forward(layer_input, adj, w, b, *, tm=128, tn=None, tk=None):
    """Pallas equivalent of GCN_layer.forward: adj @ (layer_input @ w.T + b)."""
    N, Fin = layer_input.shape
    Fout, Fin_w = w.shape
    assert Fin == Fin_w, "weight / input feature mismatch"
    assert adj.shape == (N, N), "adjacency must be [N, N]"
    assert b.shape == (Fout,), "bias must be [Fout]"

    # Tile plan: big tk, lane-dense tn, tm small enough to keep >= 2 i-blocks
    # (megacore) when N allows it.
    tm = min(tm, N)
    tk = min(512, N) if tk is None else min(tk, N)
    tn = min(512, Fout) if tn is None else min(tn, Fout)

    assert N % tm == 0 and N % tk == 0 and Fout % tn == 0, (
        f"shapes (N={N}, Fout={Fout}) must divide tiles (tm={tm}, tn={tn}, tk={tk})")
    assert tm % 8 == 0 and tk % 8 == 0
    assert tn % 128 == 0 or tn == Fout
    assert Fin % 128 == 0 or True  # Fin is passed as a full (untiled) dim

    nbi, nbj, nbk = N // tm, Fout // tn, N // tk

    # Per-(i-block, k-block) non-empty flags from the exact f32 adjacency
    # (conservative: a block is skipped only if it is all-zero).
    blk_mask = jnp.any(
        adj.reshape(nbi, tm, nbk, tk) != 0, axis=(1, 3)
    ).astype(jnp.int32)

    # bf16 MXU inputs (f32 accumulation preserved inside the kernel).
    adj_bf = adj.astype(jnp.bfloat16)
    x_bf = layer_input.astype(jnp.bfloat16)
    w_bf = w.astype(jnp.bfloat16)
    b2 = b.reshape(1, Fout).astype(jnp.float32)

    # VMEM budget: double-buffered bf16 input tiles + double-buffered f32
    # output tile; clamp so the request is valid on v7x (64 MiB physical).
    est = 2 * ((tm * tk + tk * Fin + tn * Fin) * 2 + tm * tn * 4 + tn * 4)
    vmem_limit = int(min(max(4 * est, 32 * 1024 * 1024), 48 * 1024 * 1024))

    grid = (nbi, nbj, nbk)
    return pl.pallas_call(
        fused_gcn_kernel,
        out_shape=jax.ShapeDtypeStruct((N, Fout), jnp.float32),
        grid_spec=pltpu.PrefetchScalarGridSpec(
            num_scalar_prefetch=1,
            grid=grid,
            in_specs=[
                pl.BlockSpec((tm, tk), lambda i, j, k, m: (i, k)),    # adj
                pl.BlockSpec((tk, Fin), lambda i, j, k, m: (k, 0)),   # x
                pl.BlockSpec((tn, Fin), lambda i, j, k, m: (j, 0)),   # W (native layout)
                pl.BlockSpec((1, tn), lambda i, j, k, m: (0, j)),     # bias row
            ],
            out_specs=pl.BlockSpec((tm, tn), lambda i, j, k, m: (i, j)),
        ),
        compiler_params=pltpu.CompilerParams(
            dimension_semantics=("parallel", "parallel", "arbitrary"),
            vmem_limit_bytes=vmem_limit,
        ),
    )(blk_mask, adj_bf, x_bf, w_bf, b2)


# ----------------------------- main ---------------------------------------- #

if __name__ == "__main__":
    # Small, tile-friendly shapes.
    N = 256            # number of graph nodes
    IN_FEATURES = 64
    OUT_FEATURES = 128

    key = jax.random.PRNGKey(0)
    k_x, k_w, k_b, k_a = jax.random.split(key, 4)

    # Deterministic parameter init (PyTorch Linear-style uniform bound).
    bound = 1.0 / jnp.sqrt(IN_FEATURES)
    w = jax.random.uniform(k_w, (OUT_FEATURES, IN_FEATURES),
                           minval=-bound, maxval=bound, dtype=jnp.float32)
    b = jax.random.uniform(k_b, (OUT_FEATURES,),
                           minval=-bound, maxval=bound, dtype=jnp.float32)

    # Node features.
    x = jax.random.normal(k_x, (N, IN_FEATURES), dtype=jnp.float32)

    # Deterministic sparse-ish symmetric normalized adjacency (dense layout).
    raw = jax.random.uniform(k_a, (N, N), dtype=jnp.float32)
    mask = (raw < 0.05).astype(jnp.float32)
    adj_un = jnp.maximum(mask, mask.T) + jnp.eye(N, dtype=jnp.float32)
    deg = jnp.sum(adj_un, axis=1)
    dinv = 1.0 / jnp.sqrt(deg)
    adj = adj_un * dinv[:, None] * dinv[None, :]

    out = gcn_layer_forward(x, adj, w, b)
    out = jax.block_until_ready(out)
    assert out.shape == (N, OUT_FEATURES)

    # Precision-matched reference (bf16 MXU inputs, f32 accumulation).
    h_ref = jnp.dot(x.astype(jnp.bfloat16), w.astype(jnp.bfloat16).T,
                    preferred_element_type=jnp.float32) + b
    ref_bf16 = jnp.dot(adj.astype(jnp.bfloat16), h_ref.astype(jnp.bfloat16),
                       preferred_element_type=jnp.float32)
    assert jnp.allclose(out, ref_bf16, atol=1e-2, rtol=1e-2)

    # Loose check against the full-f32 PyTorch-equivalent math.
    ref_f32 = adj @ (x @ w.T + b)
    assert jnp.allclose(out, ref_f32, atol=5e-2, rtol=5e-2)

    print("KERNEL_OK")
</pallas_src>

<mosaic_0001>
module attributes {stable_mosaic.version = 11 : i64} {
  func.func @fused_gcn_kernel(%arg0: i32, %arg1: i32, %arg2: i32, %arg3: memref<2x1xi32, #tpu.memory_space<smem>>, %arg4: memref<128x256xbf16, #tpu.memory_space<vmem>>, %arg5: memref<256x64xbf16, #tpu.memory_space<vmem>>, %arg6: memref<128x64xbf16, #tpu.memory_space<vmem>>, %arg7: memref<1x128xf32, #tpu.memory_space<vmem>>, %arg8: memref<128x128xf32, #tpu.memory_space<vmem>>) attributes {dimension_semantics = [#tpu.dimension_semantics<parallel>, #tpu.dimension_semantics<parallel>, #tpu.dimension_semantics<arbitrary>], iteration_bounds = array<i64: 2, 1, 1>, scalar_prefetch = 1 : i64, scratch_operands = 0 : i64, tpu.core_type = #tpu.core_type<tc>, window_params = [{transform_indices = @transform_0, window_bounds = array<i64: 128, 256>}, {transform_indices = @transform_1, window_bounds = array<i64: 256, 64>}, {transform_indices = @transform_2, window_bounds = array<i64: 128, 64>}, {transform_indices = @transform_3, window_bounds = array<i64: 1, 128>}, {transform_indices = @transform_4, window_bounds = array<i64: 128, 128>}]} {
    %c0_i32 = arith.constant 0 : i32
    %0 = arith.cmpi eq, %arg2, %c0_i32 : i32
    %1 = arith.extui %0 : i1 to i32
    %c0_i32_0 = arith.constant 0 : i32
    %2 = arith.cmpi ne, %1, %c0_i32_0 : i32
    scf.if %2 {
      %cst = arith.constant 0.000000e+00 : f32
      %9 = vector.broadcast %cst : f32 to vector<128x128xf32>
      %c0 = arith.constant 0 : index
      %c0_3 = arith.constant 0 : index
      %10 = vector.load %arg8[%c0, %c0_3] : memref<128x128xf32, #tpu.memory_space<vmem>>, vector<128x128xf32>
      tpu.vector_store %arg8[%c0, %c0_3], %9 {strides = array<i32>} : memref<128x128xf32, #tpu.memory_space<vmem>>, vector<128x128xf32>,
    } else {
    }
    %3 = arith.index_cast %arg0 : i32 to index
    %4 = arith.index_cast %arg2 : i32 to index
    %5 = memref.load %arg3[%3, %4] : memref<2x1xi32, #tpu.memory_space<smem>>
    %c0_i32_1 = arith.constant 0 : i32
    %6 = arith.cmpi ne, %5, %c0_i32_1 : i32
    %7 = arith.extui %6 : i1 to i32
    %c0_i32_2 = arith.constant 0 : i32
    %8 = arith.cmpi ne, %7, %c0_i32_2 : i32
    scf.if %8 {
      %c0 = arith.constant 0 : index
      %c0_3 = arith.constant 0 : index
      %9 = vector.load %arg5[%c0, %c0_3] : memref<256x64xbf16, #tpu.memory_space<vmem>>, vector<256x64xbf16>
      %c0_4 = arith.constant 0 : index
      %c0_5 = arith.constant 0 : index
      %10 = vector.load %arg6[%c0_4, %c0_5] : memref<128x64xbf16, #tpu.memory_space<vmem>>, vector<128x64xbf16>
      %cst = arith.constant dense<0.000000e+00> : vector<256x128xf32>
      %11 = tpu.matmul %9, %10, %cst {dimension_numbers = #tpu.dot_dimension_numbers<[1], [1], [0], [0], [0, 0, 1, 0], [], []>} : vector<256x64xbf16>, vector<128x64xbf16>, vector<256x128xf32> -> vector<256x128xf32>
      %c0_6 = arith.constant 0 : index
      %c0_7 = arith.constant 0 : index
      %12 = vector.load %arg7[%c0_6, %c0_7] : memref<1x128xf32, #tpu.memory_space<vmem>>, vector<1x128xf32>
      %13 = vector.broadcast %12 : vector<1x128xf32> to vector<256x128xf32>
      %14 = arith.addf %11, %13 : vector<256x128xf32>
      %c0_8 = arith.constant 0 : index
      %c0_9 = arith.constant 0 : index
      %15 = vector.load %arg8[%c0_8, %c0_9] : memref<128x128xf32, #tpu.memory_space<vmem>>, vector<128x128xf32>
      %c0_10 = arith.constant 0 : index
      %c0_11 = arith.constant 0 : index
      %16 = vector.load %arg4[%c0_10, %c0_11] : memref<128x256xbf16, #tpu.memory_space<vmem>>, vector<128x256xbf16>
      %17 = arith.truncf %14 : vector<256x128xf32> to vector<256x128xbf16>
      %cst_12 = arith.constant dense<0.000000e+00> : vector<128x128xf32>
      %18 = tpu.matmul %16, %17, %cst_12 {dimension_numbers = #tpu.dot_dimension_numbers<[1], [0], [0], [1], [0, 0, 1, 1], [], []>} : vector<128x256xbf16>, vector<256x128xbf16>, vector<128x128xf32> -> vector<128x128xf32>
      %19 = arith.addf %15, %18 : vector<128x128xf32>
      %c0_13 = arith.constant 0 : index
      %c0_14 = arith.constant 0 : index
      %20 = vector.load %arg8[%c0_13, %c0_14] : memref<128x128xf32, #tpu.memory_space<vmem>>, vector<128x128xf32>
      tpu.vector_store %arg8[%c0_13, %c0_14], %19 {strides = array<i32>} : memref<128x128xf32, #tpu.memory_space<vmem>>, vector<128x128xf32>,
    } else {
    }
    return
  }
  func.func @transform_0(%arg0: i32, %arg1: i32, %arg2: i32, %arg3: memref<2x1xi32, #tpu.memory_space<smem>>) -> (i32, i32) {
    %c0_i32 = arith.constant 0 : i32
    return %arg0, %arg2 : i32, i32
  }
  func.func @transform_1(%arg0: i32, %arg1: i32, %arg2: i32, %arg3: memref<2x1xi32, #tpu.memory_space<smem>>) -> (i32, i32) {
    %c0_i32 = arith.constant 0 : i32
    %c0_i32_0 = arith.constant 0 : i32
    return %arg2, %c0_i32 : i32, i32
  }
  func.func @transform_2(%arg0: i32, %arg1: i32, %arg2: i32, %arg3: memref<2x1xi32, #tpu.memory_space<smem>>) -> (i32, i32) {
    %c0_i32 = arith.constant 0 : i32
    %c0_i32_0 = arith.constant 0 : i32
    return %arg1, %c0_i32 : i32, i32
  }
  func.func @transform_3(%arg0: i32, %arg1: i32, %arg2: i32, %arg3: memref<2x1xi32, #tpu.memory_space<smem>>) -> (i32, i32) {
    %c0_i32 = arith.constant 0 : i32
    %c0_i32_0 = arith.constant 0 : i32
    return %c0_i32, %arg1 : i32, i32
  }
  func.func @transform_4(%arg0: i32, %arg1: i32, %arg2: i32, %arg3: memref<2x1xi32, #tpu.memory_space<smem>>) -> (i32, i32) {
    %c0_i32 = arith.constant 0 : i32
    return %arg0, %arg1 : i32, i32
  }
}

</mosaic_0001>

<bundles_post_ra>
// kernel: tpu_custom_call.1
= control target key start
LH: loop header
LB: loop body
LE: loop exit
PB: predicated region body
PF: predicated region fallthrough
CT: control target
= control target key end

     0   :  { %s1943_s0 = inlined_call_operand.vmem [shape: s32[2,1], index: 0, kind: input, shape index: {}]   ;;  %s1944_s1 = inlined_call_operand.vmem [shape: bf16[256,256], index: 1, kind: input, shape index: {}]   ;;  %s1945_s2 = inlined_call_operand.vmem [shape: bf16[256,64], index: 2, kind: input, shape index: {}]   ;;  %s1946_s3 = inlined_call_operand.vmem [shape: bf16[128,64], index: 3, kind: input, shape index: {}]   ;;  %s1947_s4 = inlined_call_operand.vmem [shape: f32[1,128], index: 4, kind: input, shape index: {}]   ;;  %s1948_s5 = inlined_call_operand.hbm [shape: f32[256,128], index: 5, kind: output, shape index: {}]  }
   0x1   :  { %s10_s20 = sshll.u32 %s1943_s0, 4  ;;  %s11_s20 = int_to_ptr.vmem [resolvable:$true] %s10_s20 }
   0x2   :  { %s1470_s21 = scalar_lea.vmem %s11_s20, 32  ;;  %p1475_p1 = scmp.lt.s32.totalorder %s11_s20, %s11_s20 }
   0x3   :  { %p1471_p0 = scmp.ne.s32.totalorder %s11_s20, %s1470_s21  ;;  %p1476_p2 = scmp.lt.s32.totalorder %s1470_s21, %s1470_s21 }
   0x5   :  { %p1477_p3 = por %p1476_p2, %p1475_p1 }
   0x7   :  { %p1478_p4 = pnand %p1477_p3, %p1471_p0 }
   0x9   :  { %1481 = shalt.err (!%p1478_p4)  }
   0xa   :  { %s1564_s22 = smov [#allocation3]  }
   0xb   :  { %13 = dma.vmem_to_smem %s11_s20, 32, %s1564_s22, [#allocation2] }
   0xc   :  { %1534 = dma.done.wait [#allocation2], 32 }
   0xd   :  { %1535 = vsyncadd [#allocation2], 4294967264 }
   0xe   :  { %15 = sfence }
   0xf   :  { %16 = vsyncpa [#allocation5], 0 }
  0x10   :  { %18 = vsyncpa [#allocation5 + $0x1], 0  ;;  %s1602_s23 = smov 0   ;;  %s1604_s24 = smov 0  }
  0x11   :  { %s1606_s0 = smov 0   ;;  %s1608_s25 = smov 0  }
  0x12   :  { %s1610_s26 = smov 0   ;;  %s1612_s27 = smov 0  }
  0x13 LB: > { %s1141_s28 = sadd.s32 4294967295, %s1562_s27   ;;  %s1142_s29 = sadd.s32 4294967294, %s1562_s27   ;;  %s1562_s27 = sphi %s1612_s27, %s24_s27   ;;  %s1558_s26 = sphi %s1610_s26, %s1955_s26   ;;  %s1554_s25 = sphi %s1608_s25, %s1954_s25   ;;  %s1550_s0 = sphi %s1606_s0, %s1953_s0   ;;  %s1546_s24 = sphi %s1604_s24, %s1952_s24   ;;  %s1542_s23 = sphi %s1602_s23, %s1951_s23  }
  0x14   : > { %s43_s30 = sadd.s32 1, %s1558_s26  ;;  %s158_s6 = sadd.s32 1, %s1550_s0 }
  0x15   : > { %p45_p5 = scmp.ge.s32.totalorder %s43_s30, 2  ;;  %p168_p6 = scmp.ne.s32.totalorder %s1550_s0, %s1546_s24 }
  0x16   : > { %p169_p7 = scmp.eq.s32.totalorder %s1141_s28, 1  ;;  %p174_p8 = scmp.ne.s32.totalorder %s1546_s24, %s1542_s23 }
  0x17   : > { %s1957_s30 = smov (%p45_p5, %s43_s30), 0  ;;  %p175_p10 = scmp.eq.s32.totalorder %s1142_s29, 1 }
  0x18   : > { %p1642_p9 = por %p169_p7, %p168_p6  ;;  %s153_s8 = ssub.s32 %s1558_s26, %s1957_s30 }
  0x19   : > { %p1148_p11 = scmp.ge.s32.totalorder %s1562_s27, 1  ;;  %p156_p12 = scmp.eq.s32.totalorder %s153_s8, 0 }
  0x1a   : > { %p1649_p13 = por %p175_p10, %p174_p8  ;;  %p232_p0 = scmp.lt.s32.totalorder %s1562_s27, 3 }
  0x1b   : > { %s1655_s10 = scalar_select %p156_p12, %s1550_s0, %s158_s6  }
  0x1c   : > { %p233_p1 = pnand %p1148_p11, %p232_p0 }
  0x1d   : > { %s273_s11 = sand.u32 (!%p233_p1), 1, %s1546_s24   ;;  %s1150_s12 = sshll.u32 (!%p233_p1), %s1554_s25, 4  ;;  %v1565_v0 = vmov (!%p233_p1), 0.0  }
  0x1e   : > { %236 = sbr.rel (%p233_p1) target bundleno = 688 (0x2b0), region = 36  ;;  %s1149_s13 = sshll.u32 (!%p233_p1), %s273_s11, 7 }
  0x1f   : > { %p278_p2 = scmp.lt.s32.totalorder (!%p233_p1), %s1150_s12, 31  ;;  %s1153_s14 = sshll.u32 (!%p233_p1), %s1554_s25, 7 }
  0x20   : > { %s1662_s15 = scalar_lea.vmem (!%p233_p1), [#allocation4], %s1149_s13  ;;  %s332_s16 = sld [smem:[#allocation3 + %s1153_s14]] (!%p233_p1) }
  0x21   : > { %309 = vst [vmem:[%s1662_s15] sm:$0xff] (!%p233_p1), %v1565_v0  ;;  %310 = vst [vmem:[%s1662_s15 + $0x8] sm:$0xff] (!%p233_p1), %v1565_v0 }
  0x22   : > { %311 = vst [vmem:[%s1662_s15 + $0x10] sm:$0xff] (!%p233_p1), %v1565_v0  ;;  %312 = vst [vmem:[%s1662_s15 + $0x18] sm:$0xff] (!%p233_p1), %v1565_v0 }
  0x23   : > { %313 = vst [vmem:[%s1662_s15 + $0x20] sm:$0xff] (!%p233_p1), %v1565_v0  ;;  %314 = vst [vmem:[%s1662_s15 + $0x28] sm:$0xff] (!%p233_p1), %v1565_v0 }
  0x24   : > { %315 = vst [vmem:[%s1662_s15 + $0x30] sm:$0xff] (!%p233_p1), %v1565_v0  ;;  %316 = vst [vmem:[%s1662_s15 + $0x38] sm:$0xff] (!%p233_p1), %v1565_v0 }
  0x25   : > { %s1959_s12 = smov (!%p278_p2, %s1150_s12), 31  ;;  %317 = vst [vmem:[%s1662_s15 + $0x40] sm:$0xff] %v1565_v0  ;;  %318 = vst [vmem:[%s1662_s15 + $0x48] sm:$0xff] %v1565_v0 }
  0x26   : > { %319 = vst [vmem:[%s1662_s15 + $0x50] sm:$0xff] %v1565_v0  ;;  %320 = vst [vmem:[%s1662_s15 + $0x58] sm:$0xff] %v1565_v0  ;;  %s1217_s17 = sshll.u32 %s1959_s12, 3  ;;  %p1154_p3 = scmp.eq.s32.totalorder %s332_s16, 0 }
  0x27   : > { %321 = vst [vmem:[%s1662_s15 + $0x60] sm:$0xff] %v1565_v0  ;;  %322 = vst [vmem:[%s1662_s15 + $0x68] sm:$0xff] %v1565_v0  ;;  %s1683_s20 = scalar_lea.vmem %s1944_s1, %s1217_s17  ;;  %v1422_v1 = vld [vmem:[%s1946_s3] sm:$0xff] (!%p1154_p3)   ;;  %vm512_vm0 = vcmask (!%p1154_p3), 523264   ;;  %v1423_v2 = vld [vmem:[%s1946_s3 + $0x8] sm:$0xff] (!%p1154_p3)  }
  0x28   : > { %323 = vst [vmem:[%s1662_s15 + $0x70] sm:$0xff] %v1565_v0  ;;  %324 = vst [vmem:[%s1662_s15 + $0x78] sm:$0xff] %v1565_v0  ;;  %336 = sbr.rel (%p1154_p3) target bundleno = 663 (0x297), region = 44  ;;  %1355 = vmatprep.subr.msk.bf16.mxu0 (!%p1154_p3), %vm512_vm0, %v1422_v1  ;;  %v562_v3 = vsel (!%p1154_p3), %vm512_vm0, %v1422_v1, 0  ;;  %v1424_v4 = vld [vmem:[%s1946_s3 + $0x10] sm:$0xff] (!%p1154_p3)   ;;  %v565_v5 = vsel (!%p1154_p3), %vm512_vm0, %v1423_v2, 0 }
  0x29   : > { %1308 = vmatpush3.bf16.xpose.msra.mxu0 (!%p1154_p3), %v562_v3  ;;  %v1430_v6 = vld [vmem:[%s1945_s2] sm:$0xff] (!%p1154_p3)   ;;  %v568_v7 = vsel (!%p1154_p3), %vm512_vm0, %v1424_v4, 0  ;;  %v1425_v8 = vld [vmem:[%s1946_s3 + $0x18] sm:$0xff] (!%p1154_p3)   ;;  %v1427_v12 = vld [vmem:[%s1946_s3 + $0x28] sm:$0xff] (!%p1154_p3)  }
  0x2a   : > { %1356 = vmatprep.subr.msk.bf16.mxu0 (!%p1154_p3), %vm512_vm0, %v1423_v2  ;;  %1323 = vmatprep.mubr.msk.bf16.mxu0 (!%p1154_p3), %vm512_vm0, %v1430_v6  ;;  %v1426_v9 = vld [vmem:[%s1946_s3 + $0x20] sm:$0xff] (!%p1154_p3)   ;;  %v571_v10 = vsel (!%p1154_p3), %vm512_vm0, %v1425_v8, 0  ;;  %v577_v13 = vsel (!%p1154_p3), %vm512_vm0, %v1427_v12, 0  ;;  %v1428_v14 = vld [vmem:[%s1946_s3 + $0x30] sm:$0xff] (!%p1154_p3)   ;;  %v1429_v16 = vld [vmem:[%s1946_s3 + $0x38] sm:$0xff] (!%p1154_p3)  }
  0x2b   : > { %v574_v11 = vsel (!%p1154_p3), %vm512_vm0, %v1426_v9, 0  ;;  %v580_v15 = vsel (!%p1154_p3), %vm512_vm0, %v1428_v14, 0  ;;  %v583_v17 = vsel (!%p1154_p3), %vm512_vm0, %v1429_v16, 0  ;;  %v1431_v18 = vld [vmem:[%s1945_s2 + $0x8] sm:$0xff] (!%p1154_p3)   ;;  %v1432_v19 = vld [vmem:[%s1945_s2 + $0x10] sm:$0xff] (!%p1154_p3)   ;;  %v1433_v20 = vld [vmem:[%s1945_s2 + $0x18] sm:$0xff] (!%p1154_p3)  }
  0x2c   : > { %v1434_v21 = vld [vmem:[%s1945_s2 + $0x20] sm:$0xff] (!%p1154_p3)   ;;  %v1435_v22 = vld [vmem:[%s1945_s2 + $0x28] sm:$0xff] (!%p1154_p3)   ;;  %v1436_v23 = vld [vmem:[%s1945_s2 + $0x30] sm:$0xff] (!%p1154_p3)  }
  0x2d   : > { %v1437_v24 = vld [vmem:[%s1945_s2 + $0x38] sm:$0xff] (!%p1154_p3)   ;;  %v1438_v25 = vld [vmem:[%s1945_s2 + $0x40] sm:$0xff] (!%p1154_p3)   ;;  %v1439_v26 = vld [vmem:[%s1945_s2 + $0x48] sm:$0xff] (!%p1154_p3)  }
  0x2e   : > { %v1440_v27 = vld [vmem:[%s1945_s2 + $0x50] sm:$0xff] (!%p1154_p3)   ;;  %v1441_v28 = vld [vmem:[%s1945_s2 + $0x58] sm:$0xff] (!%p1154_p3)   ;;  %v1442_v29 = vld [vmem:[%s1945_s2 + $0x60] sm:$0xff] (!%p1154_p3)  }
  0x2f   : > { %v1443_v30 = vld [vmem:[%s1945_s2 + $0x68] sm:$0xff]   ;;  %v1444_v31 = vld [vmem:[%s1945_s2 + $0x70] sm:$0xff]   ;;  %v1445_v32 = vld [vmem:[%s1945_s2 + $0x78] sm:$0xff]  }
  0x30   : > { %v1448_v33 = vld [vmem:[%s1683_s20 + $0x4] ss:$8 sps:$4 sm:$0xff]   ;;  %v1793_v35 = vld [vmem:[%s1947_s4] ss:$0 sm:$0xff] }
  0x31   : > { %1310 = vmatpush3.bf16.xpose.msra.mxu0 %v565_v5  ;;  %906 = vmatprep.mubr.bf16.mxu1 %v1448_v33 }
  0x32   : > { %1357 = vmatprep.subr.msk.bf16.mxu0 %vm512_vm0, %v1424_v4 }
  0x39   : > { %1312 = vmatpush3.bf16.xpose.msra.mxu0 %v568_v7 }
  0x3a   : > { %1358 = vmatprep.subr.msk.bf16.mxu0 %vm512_vm0, %v1425_v8 }
  0x41   : > { %1314 = vmatpush3.bf16.xpose.msra.mxu0 %v571_v10 }
  0x42   : > { %1359 = vmatprep.subr.msk.bf16.mxu0 %vm512_vm0, %v1426_v9 }
  0x49   : > { %1316 = vmatpush3.bf16.xpose.msra.mxu0 %v574_v11 }
  0x4a   : > { %1360 = vmatprep.subr.msk.bf16.mxu0 %vm512_vm0, %v1427_v12 }
  0x51   : > { %1318 = vmatpush3.bf16.xpose.msra.mxu0 %v577_v13 }
  0x52   : > { %1361 = vmatprep.subr.msk.bf16.mxu0 %vm512_vm0, %v1428_v14 }
  0x59   : > { %1320 = vmatpush3.bf16.xpose.msra.mxu0 %v580_v15 }
  0x5a   : > { %1362 = vmatprep.subr.msk.bf16.mxu0 %vm512_vm0, %v1429_v16 }
  0x61   : > { %1322 = vmatpush3.bf16.xpose.msra.mxu0 %v583_v17 }
  0x68   : > { %1324 = vmatmul.mubr.msk.bf16.vlgmr.msra.gmra.mrb[0].mxu0 %vm512_vm0, %v1431_v18 }
  0x69   : > { %1327 = vmatprep.mubr.msk.bf16.mxu0 %vm512_vm0, %v1432_v19 }
  0x70   : > { %1328 = vmatmul.mubr.msk.bf16.gmra.mrb[4].mxu0 %vm512_vm0, %v1433_v20 }
  0x71   : > { %1331 = vmatprep.mubr.msk.bf16.mxu0 %vm512_vm0, %v1434_v21 }
  0x78   : > { %1332 = vmatmul.mubr.msk.bf16.gmra.mrb[8].mxu0 %vm512_vm0, %v1435_v22 }
  0x79   : > { %1335 = vmatprep.mubr.msk.bf16.mxu0 %vm512_vm0, %v1436_v23 }
  0x80   : > { %1336 = vmatmul.mubr.msk.bf16.gmra.mrb[12].mxu0 %vm512_vm0, %v1437_v24 }
  0x81   : > { %1339 = vmatprep.mubr.msk.bf16.mxu0 %vm512_vm0, %v1438_v25 }
  0x88   : > { %1340 = vmatmul.mubr.msk.bf16.gmra.mrb[16].mxu0 %vm512_vm0, %v1439_v26 }
  0x89   : > { %1343 = vmatprep.mubr.msk.bf16.mxu0 %vm512_vm0, %v1440_v27 }
  0x90   : > { %1344 = vmatmul.mubr.msk.bf16.gmra.mrb[20].mxu0 %vm512_vm0, %v1441_v28 }
  0x91   : > { %1347 = vmatprep.mubr.msk.bf16.mxu0 %vm512_vm0, %v1442_v29 }
  0x98   : > { %1348 = vmatmul.mubr.msk.bf16.gmra.mrb[24].mxu0 %vm512_vm0, %v1443_v30 }
  0x99   : > { %1351 = vmatprep.mubr.msk.bf16.mxu0 %vm512_vm0, %v1444_v31 }
  0xa0   : > { %1352 = vmatmul.mubr.msk.bf16.gmra.mrb[28].mxu0 %vm512_vm0, %v1445_v32 }
 0x13b   : > { %v1325_v34 = vpop.f32.mrb[0].mxu0 }
 0x13c   : > { %v619_v36 = vpop.f32.mrb[1].mxu0  ;;  %v628_v38 = vadd.f32 %v1325_v34, %v1793_v35 }
 0x13d   : > { %v1326_v37 = vpop.f32.mrb[2].mxu0  ;;  %v620_v41 = vadd.f32 %v1793_v35, %v619_v36 }
 0x13e   : > { %v631_v39 = vadd.f32 %v1326_v37, %v1793_v35  ;;  %v622_v40 = vpop.f32.mrb[3].mxu0 }
 0x13f   : > { %v623_v42 = vadd.f32 %v1793_v35, %v622_v40 }
 0x140   : > { %v779_v43 = vpack.c.bf16 %v631_v39, %v628_v38 }
 0x141   : > { %v778_v44 = vpack.c.bf16 %v623_v42, %v620_v41 }
 0x143   : > { %v1329_v45 = vpop.f32.mrb[4].mxu0 }
 0x144   : > { %v635_v46 = vpop.f32.mrb[5].mxu0  ;;  %v1800_v48 = vadd.f32 %v1329_v45, %v1793_v35 }
 0x145   : > { %v1330_v47 = vpop.f32.mrb[6].mxu0  ;;  %v636_v51 = vadd.f32 %v1793_v35, %v635_v46 }
 0x146   : > { %v647_v49 = vadd.f32 %v1330_v47, %v1793_v35  ;;  %v638_v50 = vpop.f32.mrb[7].mxu0 }
 0x147   : > { %v639_v52 = vadd.f32 %v1793_v35, %v638_v50 }
 0x148   : > { %v781_v53 = vpack.c.bf16 %v647_v49, %v1800_v48 }
 0x149   : > { %v780_v54 = vpack.c.bf16 %v639_v52, %v636_v51  ;;  %v1446_v52 = vld [vmem:[%s1683_s20] ss:$8 sps:$4 sm:$0xff]  }
 0x14b   : > { %v1333_v55 = vpop.f32.mrb[8].mxu0 }
 0x14c   : > { %v651_v56 = vpop.f32.mrb[9].mxu0  ;;  %v1807_v58 = vadd.f32 %v1333_v55, %v1793_v35  ;;  %v1454_v55 = vld [vmem:[%s1683_s20 + $0x20] ss:$8 sps:$4 sm:$0xff]  }
 0x14d   : > { %v1334_v57 = vpop.f32.mrb[10].mxu0  ;;  %v652_v61 = vadd.f32 %v1793_v35, %v651_v56  ;;  %v1455_v56 = vld [vmem:[%s1683_s20 + $0x34] ss:$8 sps:$4 sm:$0xff]  }
 0x14e   : > { %v1810_v59 = vadd.f32 %v1334_v57, %v1793_v35  ;;  %v654_v60 = vpop.f32.mrb[11].mxu0  ;;  %v1457_v57 = vld [vmem:[%s1683_s20 + $0x30] ss:$8 sps:$4 sm:$0xff]  }
 0x14f   : > { %v655_v62 = vadd.f32 %v1793_v35, %v654_v60  ;;  %v1461_v60 = vld [vmem:[%s1683_s20 + $0x54] ss:$8 sps:$4 sm:$0xff]  }
 0x150   : > { %v783_v63 = vpack.c.bf16 %v1810_v59, %v1807_v58  ;;  %v1458_v58 = vld [vmem:[%s1683_s20 + $0x44] ss:$8 sps:$4 sm:$0xff]   ;;  %v1460_v59 = vld [vmem:[%s1683_s20 + $0x40] ss:$8 sps:$4 sm:$0xff]  }
 0x151   : > { %v782_v0 = vpack.c.bf16 %v655_v62, %v652_v61  ;;  %v1463_v61 = vld [vmem:[%s1683_s20 + $0x50] ss:$8 sps:$4 sm:$0xff]   ;;  %v1464_v62 = vld [vmem:[%s1683_s20 + $0x64] ss:$8 sps:$4 sm:$0xff]  }
 0x153   : > { %v1337_v1 = vpop.f32.mrb[12].mxu0 }
 0x154   : > { %v667_v2 = vpop.f32.mrb[13].mxu0  ;;  %v1817_v4 = vadd.f32 %v1337_v1, %v1793_v35  ;;  %v1469_v1 = vld [vmem:[%s1683_s20 + $0x70] ss:$8 sps:$4 sm:$0xff]  }
 0x155   : > { %v1338_v3 = vpop.f32.mrb[14].mxu0  ;;  %v668_v7 = vadd.f32 %v1793_v35, %v667_v2 }
 0x156   : > { %v679_v5 = vadd.f32 %v1338_v3, %v1793_v35  ;;  %v670_v6 = vpop.f32.mrb[15].mxu0  ;;  %v746_v3 = vld [vmem:[%s1662_s15] sm:$0xff] }
 0x157   : > { %v671_v8 = vadd.f32 %v1793_v35, %v670_v6 }
 0x158   : > { %v785_v9 = vpack.c.bf16 %v679_v5, %v1817_v4 }
 0x159   : > { %v784_v10 = vpack.c.bf16 %v671_v8, %v668_v7  ;;  %v747_v7 = vld [vmem:[%s1662_s15 + $0x8] sm:$0xff] }
 0x15b   : > { %v1341_v11 = vpop.f32.mrb[16].mxu0 }
 0x15c   : > { %v683_v12 = vpop.f32.mrb[17].mxu0  ;;  %v692_v14 = vadd.f32 %v1341_v11, %v1793_v35 }
 0x15d   : > { %v1342_v13 = vpop.f32.mrb[18].mxu0  ;;  %v684_v17 = vadd.f32 %v1793_v35, %v683_v12 }
 0x15e   : > { %v695_v15 = vadd.f32 %v1342_v13, %v1793_v35  ;;  %v686_v16 = vpop.f32.mrb[19].mxu0  ;;  %v748_v13 = vld [vmem:[%s1662_s15 + $0x10] sm:$0xff] }
 0x15f   : > { %v687_v18 = vadd.f32 %v1793_v35, %v686_v16 }
 0x160   : > { %v787_v19 = vpack.c.bf16 %v695_v15, %v692_v14 }
 0x161   : > { %v786_v20 = vpack.c.bf16 %v687_v18, %v684_v17  ;;  %v749_v17 = vld [vmem:[%s1662_s15 + $0x18] sm:$0xff] }
 0x163   : > { %v1345_v21 = vpop.f32.mrb[20].mxu0  ;;  %1243 = vmatprep.subr.bf16.mxu1 %v786_v20 }
 0x164   : > { %v699_v22 = vpop.f32.mrb[21].mxu0  ;;  %1244 = vmatpush3.bf16.msra.mxu1 %v778_v44  ;;  %v708_v24 = vadd.f32 %v1345_v21, %v1793_v35 }
 0x165   : > { %v1346_v23 = vpop.f32.mrb[22].mxu0  ;;  %1245 = vmatprep.subr.bf16.mxu1 %v787_v19  ;;  %v700_v27 = vadd.f32 %v1793_v35, %v699_v22 }
 0x166   : > { %v711_v25 = vadd.f32 %v1346_v23, %v1793_v35  ;;  %v702_v26 = vpop.f32.mrb[23].mxu0  ;;  %v750_v23 = vld [vmem:[%s1662_s15 + $0x20] sm:$0xff] }
 0x167   : > { %v703_v28 = vadd.f32 %v1793_v35, %v702_v26 }
 0x168   : > { %v789_v29 = vpack.c.bf16 %v711_v25, %v708_v24  ;;  %1246 = vmatpush3.bf16.msra.mxu1 %v779_v43 }
 0x169   : > { %v788_v30 = vpack.c.bf16 %v703_v28, %v700_v27  ;;  %v751_v27 = vld [vmem:[%s1662_s15 + $0x28] sm:$0xff] }
 0x16b   : > { %v1349_v31 = vpop.f32.mrb[24].mxu0  ;;  %1247 = vmatprep.subr.bf16.mxu1 %v788_v30 }
 0x16c   : > { %v715_v32 = vpop.f32.mrb[25].mxu0  ;;  %1248 = vmatpush3.bf16.msra.mxu1 %v780_v54  ;;  %v724_v34 = vadd.f32 %v1349_v31, %v1793_v35  ;;  %v1451_v54 = vld [vmem:[%s1683_s20 + $0x10] ss:$8 sps:$4 sm:$0xff]  }
 0x16d   : > { %v1350_v33 = vpop.f32.mrb[26].mxu0  ;;  %1249 = vmatprep.subr.bf16.mxu1 %v789_v29  ;;  %v716_v38 = vadd.f32 %v1793_v35, %v715_v32 }
 0x16e   : > { %v727_v36 = vadd.f32 %v1350_v33, %v1793_v35  ;;  %v718_v37 = vpop.f32.mrb[27].mxu0  ;;  %v752_v33 = vld [vmem:[%s1662_s15 + $0x30] sm:$0xff] }
 0x16f   : > { %v719_v39 = vadd.f32 %v1793_v35, %v718_v37 }
 0x170   : > { %v791_v40 = vpack.c.bf16 %v727_v36, %v724_v34  ;;  %1250 = vmatpush3.bf16.msra.mxu1 %v781_v53  ;;  %v1449_v53 = vld [vmem:[%s1683_s20 + $0x14] ss:$8 sps:$4 sm:$0xff]  }
 0x171   : > { %v790_v41 = vpack.c.bf16 %v719_v39, %v716_v38  ;;  %v753_v38 = vld [vmem:[%s1662_s15 + $0x38] sm:$0xff] }
 0x173   : > { %v1353_v42 = vpop.f32.mrb[28].mxu0  ;;  %1251 = vmatprep.subr.bf16.mxu1 %v790_v41 }
 0x174   : > { %v731_v43 = vpop.f32.mrb[29].mxu0  ;;  %1252 = vmatpush3.bf16.msra.mxu1 %v782_v0  ;;  %v740_v45 = vadd.f32 %v1353_v42, %v1793_v35  ;;  %v1467_v0 = vld [vmem:[%s1683_s20 + $0x74] ss:$8 sps:$4 sm:$0xff]  }
 0x175   : > { %v1354_v44 = vpop.f32.mrb[30].mxu0  ;;  %1253 = vmatprep.subr.bf16.mxu1 %v791_v40  ;;  %v732_v48 = vadd.f32 %v1793_v35, %v731_v43 }
 0x176   : > { %v743_v46 = vadd.f32 %v1354_v44, %v1793_v35  ;;  %v734_v47 = vpop.f32.mrb[31].mxu0  ;;  %v754_v44 = vld [vmem:[%s1662_s15 + $0x40] sm:$0xff] }
 0x177   : > { %v735_v49 = vadd.f32 %v1793_v35, %v734_v47  ;;  %v1452_v35 = vld [vmem:[%s1683_s20 + $0x24] ss:$8 sps:$4 sm:$0xff]  }
 0x178   : > { %v793_v50 = vpack.c.bf16 %v743_v46, %v740_v45  ;;  %1254 = vmatpush3.bf16.msra.mxu1 %v783_v63  ;;  %v1466_v63 = vld [vmem:[%s1683_s20 + $0x60] ss:$8 sps:$4 sm:$0xff]  }
 0x179   : > { %v792_v51 = vpack.c.bf16 %v735_v49, %v732_v48  ;;  %v755_v48 = vld [vmem:[%s1662_s15 + $0x48] sm:$0xff] }
 0x17b   : > { %1255 = vmatprep.subr.bf16.mxu1 %v792_v51 }
 0x17c   : > { %1256 = vmatpush3.bf16.msra.mxu1 %v784_v10 }
 0x17d   : > { %1257 = vmatprep.subr.bf16.mxu1 %v793_v50 }
 0x180   : > { %1258 = vmatpush3.bf16.msra.mxu1 %v785_v9 }
 0x183   : > { %907 = vmatmul.mubr.bf16.vlgmr.msra.gmra.mrb[0].mxu1 %v1446_v52 }
 0x184   : > { %914 = vmatprep.mubr.bf16.mxu1 %v1449_v53 }
 0x18b   : > { %915 = vmatmul.mubr.bf16.gmra.mrb[4].mxu1 %v1451_v54  ;;  %v756_v54 = vld [vmem:[%s1662_s15 + $0x50] sm:$0xff] }
 0x18c   : > { %922 = vmatprep.mubr.bf16.mxu1 %v1452_v35 }
 0x193   : > { %923 = vmatmul.mubr.bf16.gmra.mrb[8].mxu1 %v1454_v55 }
 0x194   : > { %930 = vmatprep.mubr.bf16.mxu1 %v1455_v56 }
 0x19b   : > { %931 = vmatmul.mubr.bf16.gmra.mrb[12].mxu1 %v1457_v57  ;;  %v757_v57 = vld [vmem:[%s1662_s15 + $0x58] sm:$0xff] }
 0x19c   : > { %938 = vmatprep.mubr.bf16.mxu1 %v1458_v58 }
 0x1a3   : > { %939 = vmatmul.mubr.bf16.gmra.mrb[16].mxu1 %v1460_v59 }
 0x1a4   : > { %946 = vmatprep.mubr.bf16.mxu1 %v1461_v60 }
 0x1ab   : > { %947 = vmatmul.mubr.bf16.gmra.mrb[20].mxu1 %v1463_v61 }
 0x1ac   : > { %954 = vmatprep.mubr.bf16.mxu1 %v1464_v62 }
 0x1b3   : > { %955 = vmatmul.mubr.bf16.gmra.mrb[24].mxu1 %v1466_v63  ;;  %v758_v63 = vld [vmem:[%s1662_s15 + $0x60] sm:$0xff] }
 0x1b4   : > { %962 = vmatprep.mubr.bf16.mxu1 %v1467_v0 }
 0x1bb   : > { %963 = vmatmul.mubr.bf16.gmra.mrb[28].mxu1 %v1469_v1 }
 0x256   : > { %v1259_v2 = vpop.f32.mrb[0].mxu1 }
 0x257   : > { %v1260_v4 = vpop.f32.mrb[1].mxu1 }
 0x258   : > { %v1261_v5 = vadd.f32 %v1260_v4, %v1259_v2  ;;  %v1262_v6 = vpop.f32.mrb[2].mxu1 }
 0x259   : > { %v1263_v8 = vpop.f32.mrb[3].mxu1 }
 0x25a   : > { %v971_v9 = vadd.f32 %v1261_v5, %v746_v3  ;;  %v1264_v10 = vadd.f32 %v1263_v8, %v1262_v6  ;;  %v759_v3 = vld [vmem:[%s1662_s15 + $0x68] sm:$0xff] }
 0x25c   : > { %987 = vst [vmem:[%s1662_s15] sm:$0xff] %v971_v9  ;;  %v972_v11 = vadd.f32 %v1264_v10, %v747_v7  ;;  %v760_v9 = vld [vmem:[%s1662_s15 + $0x70] sm:$0xff] }
 0x25e   : > { %988 = vst [vmem:[%s1662_s15 + $0x8] sm:$0xff] %v972_v11  ;;  %v1265_v12 = vpop.f32.mrb[4].mxu1 }
 0x25f   : > { %v1266_v14 = vpop.f32.mrb[5].mxu1 }
 0x260   : > { %v1267_v15 = vadd.f32 %v1266_v14, %v1265_v12  ;;  %v1268_v16 = vpop.f32.mrb[6].mxu1 }
 0x261   : > { %v1269_v18 = vpop.f32.mrb[7].mxu1 }
 0x262   : > { %v973_v19 = vadd.f32 %v1267_v15, %v748_v13  ;;  %v1270_v20 = vadd.f32 %v1269_v18, %v1268_v16  ;;  %v761_v13 = vld [vmem:[%s1662_s15 + $0x78] sm:$0xff] }
 0x264   : > { %989 = vst [vmem:[%s1662_s15 + $0x10] sm:$0xff] %v973_v19  ;;  %v974_v21 = vadd.f32 %v1270_v20, %v749_v17 }
 0x266   : > { %990 = vst [vmem:[%s1662_s15 + $0x18] sm:$0xff] %v974_v21  ;;  %v1271_v22 = vpop.f32.mrb[8].mxu1 }
 0x267   : > { %v1272_v24 = vpop.f32.mrb[9].mxu1 }
 0x268   : > { %v1273_v25 = vadd.f32 %v1272_v24, %v1271_v22  ;;  %v1274_v26 = vpop.f32.mrb[10].mxu1 }
 0x269   : > { %v1275_v28 = vpop.f32.mrb[11].mxu1 }
 0x26a   : > { %v975_v29 = vadd.f32 %v1273_v25, %v750_v23  ;;  %v1276_v30 = vadd.f32 %v1275_v28, %v1274_v26 }
 0x26c   : > { %991 = vst [vmem:[%s1662_s15 + $0x20] sm:$0xff] %v975_v29  ;;  %v976_v31 = vadd.f32 %v1276_v30, %v751_v27 }
 0x26e   : > { %992 = vst [vmem:[%s1662_s15 + $0x28] sm:$0xff] %v976_v31  ;;  %v1277_v32 = vpop.f32.mrb[12].mxu1 }
 0x26f   : > { %v1278_v34 = vpop.f32.mrb[13].mxu1 }
 0x270   : > { %v1279_v36 = vadd.f32 %v1278_v34, %v1277_v32  ;;  %v1280_v37 = vpop.f32.mrb[14].mxu1 }
 0x271   : > { %v1281_v39 = vpop.f32.mrb[15].mxu1 }
 0x272   : > { %v977_v40 = vadd.f32 %v1279_v36, %v752_v33  ;;  %v1282_v41 = vadd.f32 %v1281_v39, %v1280_v37 }
 0x274   : > { %993 = vst [vmem:[%s1662_s15 + $0x30] sm:$0xff] %v977_v40  ;;  %v978_v42 = vadd.f32 %v1282_v41, %v753_v38 }
 0x276   : > { %994 = vst [vmem:[%s1662_s15 + $0x38] sm:$0xff] %v978_v42  ;;  %v1283_v43 = vpop.f32.mrb[16].mxu1 }
 0x277   : > { %v1284_v45 = vpop.f32.mrb[17].mxu1 }
 0x278   : > { %v1285_v46 = vadd.f32 %v1284_v45, %v1283_v43  ;;  %v1286_v47 = vpop.f32.mrb[18].mxu1 }
 0x279   : > { %v1287_v49 = vpop.f32.mrb[19].mxu1 }
 0x27a   : > { %v979_v50 = vadd.f32 %v1285_v46, %v754_v44  ;;  %v1288_v51 = vadd.f32 %v1287_v49, %v1286_v47 }
 0x27c   : > { %995 = vst [vmem:[%s1662_s15 + $0x40] sm:$0xff] %v979_v50  ;;  %v980_v52 = vadd.f32 %v1288_v51, %v755_v48 }
 0x27e   : > { %996 = vst [vmem:[%s1662_s15 + $0x48] sm:$0xff] %v980_v52  ;;  %v1289_v53 = vpop.f32.mrb[20].mxu1 }
 0x27f   : > { %v1290_v35 = vpop.f32.mrb[21].mxu1 }
 0x280   : > { %v1291_v55 = vadd.f32 %v1290_v35, %v1289_v53  ;;  %v1292_v56 = vpop.f32.mrb[22].mxu1 }
 0x281   : > { %v1293_v58 = vpop.f32.mrb[23].mxu1 }
 0x282   : > { %v981_v59 = vadd.f32 %v1291_v55, %v756_v54  ;;  %v1294_v60 = vadd.f32 %v1293_v58, %v1292_v56 }
 0x284   : > { %997 = vst [vmem:[%s1662_s15 + $0x50] sm:$0xff] %v981_v59  ;;  %v982_v61 = vadd.f32 %v1294_v60, %v757_v57 }
 0x286   : > { %998 = vst [vmem:[%s1662_s15 + $0x58] sm:$0xff] %v982_v61  ;;  %v1295_v62 = vpop.f32.mrb[24].mxu1 }
 0x287   : > { %v1296_v0 = vpop.f32.mrb[25].mxu1 }
 0x288   : > { %v1297_v1 = vadd.f32 %v1296_v0, %v1295_v62  ;;  %v1298_v2 = vpop.f32.mrb[26].mxu1 }
 0x289   : > { %v1299_v4 = vpop.f32.mrb[27].mxu1 }
 0x28a   : > { %v983_v5 = vadd.f32 %v1297_v1, %v758_v63  ;;  %v1300_v6 = vadd.f32 %v1299_v4, %v1298_v2 }
 0x28c   : > { %999 = vst [vmem:[%s1662_s15 + $0x60] sm:$0xff] %v983_v5  ;;  %v984_v7 = vadd.f32 %v1300_v6, %v759_v3 }
 0x28e   : > { %1000 = vst [vmem:[%s1662_s15 + $0x68] sm:$0xff] %v984_v7  ;;  %v1301_v8 = vpop.f32.mrb[28].mxu1 }
 0x28f   : > { %v1302_v10 = vpop.f32.mrb[29].mxu1 }
 0x290   : > { %v1303_v11 = vadd.f32 %v1302_v10, %v1301_v8  ;;  %v1304_v12 = vpop.f32.mrb[30].mxu1 }
 0x291   : > { %v1305_v14 = vpop.f32.mrb[31].mxu1 }
 0x292   : > { %v985_v15 = vadd.f32 %v1303_v11, %v760_v9  ;;  %v1306_v16 = vadd.f32 %v1305_v14, %v1304_v12 }
 0x294   : > { %1001 = vst [vmem:[%s1662_s15 + $0x70] sm:$0xff] %v985_v15  ;;  %v986_v17 = vadd.f32 %v1306_v16, %v761_v13 }
 0x296   : > { %1002 = vst [vmem:[%s1662_s15 + $0x78] sm:$0xff] %v986_v17 }
 0x297 PF: > { %s1218_s20 = sshll.u32 %s1554_s25, 11  ;;  %s1018_s22 = sshll.u32 %s1662_s15, 4  ;;  %s1893_s22 = int_to_ptr.vmem [resolvable:$true] %s1018_s22 }
 0x298   : > { %s1890_s21 = scalar_lea.hbm %s1948_s5, %s1218_s20  ;;  %s1897_s28 = scalar_lea.sflag [#allocation5], %s273_s11 }
 0x299   : > { %s1482_s29 = scalar_lea.vmem %s1893_s22, 2048  ;;  %s1566_s25 = smov [#allocation4]  }
 0x29a   : > { %p1483_p4 = scmp.ne.s32.totalorder %s1893_s22, %s1482_s29  ;;  %s1486_s6 = sshll.u32 %s1566_s25, 4  ;;  %s1487_s6 = int_to_ptr.vmem [resolvable:$false] %s1486_s6 }
 0x29b   : > { %s1488_s8 = scalar_lea.vmem %s1487_s6, 4096  ;;  %p1489_p7 = scmp.lt.s32.totalorder %s1893_s22, %s1487_s6 }
 0x29c   : > { %p1484_p5 = pnand %p1483_p4, %p1642_p9  ;;  %p1490_p8 = scmp.lt.s32.totalorder %s1488_s8, %s1482_s29 }
 0x29e   : > { %p1485_p6 = pneg %p1484_p5  ;;  %p1491_p10 = por %p1490_p8, %p1489_p7 }
 0x2a0   : > { %p1492_p11 = pnand %p1491_p10, %p1485_p6 }
 0x2a2   : > { %1495 = shalt.err (!%p1492_p11)
}
 0x2a3   : > { %s1496_s11 = scalar_lea.hbm %s1890_s21, 2048  ;;  %s1500_s13 = scalar_lea.hbm %s1948_s5, 4096 }
 0x2a4   : > { %p1497_p12 = scmp.ne.s32.totalorder %s1890_s21, %s1496_s11  ;;  %p1501_p2 = scmp.lt.u32.totalorder %s1890_s21, %s1948_s5 }
 0x2a5   : > { %p1502_p3 = scmp.lt.u32.totalorder %s1500_s13, %s1496_s11  ;;  %p1504_p5 = scmp.lt.u32.totalorder %s1496_s11, %s1890_s21 }
 0x2a6   : > { %p1498_p0 = pnand %p1497_p12, %p1642_p9 }
 0x2a7   : > { %p1503_p4 = por %p1502_p3, %p1501_p2 }
 0x2a8   : > { %p1499_p1 = pneg %p1498_p0 }
 0x2a9   : > { %p1505_p6 = por %p1504_p5, %p1503_p4 }
 0x2ab   : > { %p1506_p7 = pnand %p1505_p6, %p1499_p1 }
 0x2ad   : > { %1509 = shalt.err (!%p1506_p7)
}
 0x2ae   : > { %s1567_s17 = smov 128   ;;  %s1568_s20 = smov 8  }
 0x2af   : > { %1363 = dma.vmem_to_hbm [thread:$0]  (%p1642_p9), %s1893_s22, 2048, %s1890_s21, %s1897_s28, %s1567_s17, %s1567_s17, %s1568_s20  }
 0x2b0 PF: > { %p1369_p8 = scmp.ge.s32.totalorder %s1562_s27, 2  ;;  %s1033_s18 = sand.u32 1, %s1542_s23  }
 0x2b1   : > { %s1034_s19 = scalar_lea.sflag [#allocation5], %s1033_s18 }
 0x2b2   : > { %p1366_p10 = pnand %p1369_p8, %p1649_p13 }
 0x2b4   : > { %1537 = dma.done.wait (!%p1366_p10), %s1034_s19, 2048  }
 0x2b5   : > { %1539 = vsyncadd (!%p1366_p10), %s1034_s19, 4294965248  ;;  %s24_s27 = sadd.s32 1, %s1562_s27   ;;  %s1951_s23 = smov %s1546_s24 }
 0x2b6   : > { %p21_p11 = scmp.ge.s32.totalorder %s24_s27, 4   ;;  %s1952_s24 = smov %s1550_s0 }
 0x2b7   : > { %s1953_s0 = smov %s1655_s10  ;;  %s1954_s25 = smov %s1558_s26 }
 0x2b8   : > { %s1955_s26 = smov %s1957_s30  ;;  %23 = sbr.rel (!%p21_p11) target bundleno = 19 (0x13), region = 88 }
 0x2bf   :  { %1039 = vsyncpa [#allocation5], 1 }
 0x2c0   :  { %1041 = vsyncpa [#allocation5 + $0x1], 1 }

</bundles_post_ra>
